<compile_context>
chip_gen: v7x
topology: tpu7x:2x2x1
jax: 0.10.0
libtpu: 0.0.40
codegen_flags: <defaults>
</compile_context>

<pallas_src>
import jax
import jax.numpy as jnp
from jax import lax
from jax.experimental import pallas as pl
from jax.experimental.pallas import tpu as pltpu

_EPS = 1e-5   # BatchNorm eps (torch default)


def _pick_tile_h(h, w):
    """Smallest divisor of H whose row-block is lane-dense ((tile_h*W) % 128 == 0)."""
    for t in range(1, h + 1):
        if h % t == 0 and (t * w) % 128 == 0:
            return t
    return h   # fallback: whole image per step (full-dim blocks are always legal)


def _dense_layer_kernel(x_ref, top_ref, bot_ref, s1_ref, o1_ref, w1_ref, o2_ref,
                        w2_ref, out_ref):
    """One (batch, H row-block) grid step, channels-on-sublanes layout.

    x_ref   : (C_in, TILE_H*W)        row-block of x, NCHW flattened (f32/bf16 as given)
    top_ref : (1, C_in, W)            row above the block (zeros at the image top)
    bot_ref : (1, C_in, W)            row below the block (zeros at the image bottom)
    s1_ref  : (C_in, 1)   f32         folded BN1 scale
    o1_ref  : (C_in, 1)   f32         folded BN1 shift
    w1_ref  : (C_mid, C_in) bf16      1x1 conv weights with BN2 scale folded in
    o2_ref  : (C_mid, 1)  f32         folded BN2 shift
    w2_ref  : (3, C_out, 3*C_mid) bf16  3x3 taps, [dy, o, dx*C_mid + c]
    out_ref : (C_out + C_in, TILE_H*W)  [new features ; original x] channel concat
    """
    c_in, hw = x_ref.shape
    w_img = top_ref.shape[2]
    c_mid = w1_ref.shape[0]
    c_out = w2_ref.shape[1]
    hw_ext = hw + 2 * w_img

    hb = pl.program_id(1)
    n_hb = pl.num_programs(1)

    # ---- extended slab (halo row above + block + halo row below) ------------------
    x_ext = jnp.concatenate([top_ref[0], x_ref[...], bot_ref[0]],
                            axis=1).astype(jnp.float32)              # (C_in, hw_ext)

    # ---- BN1 (inference, folded) + ReLU : VPU, full lane occupancy ----------------
    act = jnp.maximum(x_ext * s1_ref[...] + o1_ref[...], 0.0)

    # ---- 1x1 conv (BN2 scale folded into weights) + BN2 shift + ReLU : MXU, bf16 --
    mid = jnp.dot(w1_ref[...], act.astype(jnp.bfloat16),
                  preferred_element_type=jnp.float32)                 # (C_mid, hw_ext)
    mid = jnp.maximum(mid + o2_ref[...], 0.0)

    # ---- zero the halo rows that fall outside the image (3x3 conv H zero-padding) -
    lane_ext = lax.broadcasted_iota(jnp.int32, (1, hw_ext), 1)
    pad_top = jnp.logical_and(lane_ext < w_img, hb == 0)
    pad_bot = jnp.logical_and(lane_ext >= hw_ext - w_img, hb == n_hb - 1)
    mid = jnp.where(jnp.logical_or(pad_top, pad_bot), 0.0, mid)

    # ---- 3x3 conv, padding=1, as 3 K-stacked MXU matmuls (K = 3*C_mid) ------------
    # Column (W) zero-padding: masks on the output lanes.
    lane = lax.broadcasted_iota(jnp.int32, (1, hw), 1)
    w_pos = lane % w_img
    not_first = w_pos != 0            # dx=0 tap needs column w-1
    not_last = w_pos != (w_img - 1)   # dx=2 tap needs column w+1

    # 1-lane zero pad on each side so every tap is an in-range lane slice; the dx
    # shifts below are value-level lane shifts and lower to XLU rotates (slack slot).
    zcol = jnp.zeros((c_mid, 1), jnp.float32)
    midp = jnp.concatenate([zcol, mid, zcol], axis=1)                 # (C_mid, hw_ext+2)

    acc = None
    for dy in range(3):                               # short static loop: fully unrolled
        b0 = dy * w_img
        t0 = jnp.where(not_first, midp[:, b0:b0 + hw], 0.0)          # mid[.., w-1]
        t1 = midp[:, b0 + 1:b0 + 1 + hw]                             # mid[.., w  ]
        t2 = jnp.where(not_last, midp[:, b0 + 2:b0 + 2 + hw], 0.0)   # mid[.., w+1]
        stacked = jnp.concatenate([t0, t1, t2], axis=0).astype(jnp.bfloat16)
        part = jnp.dot(w2_ref[dy], stacked, preferred_element_type=jnp.float32)
        acc = part if acc is None else acc + part                    # (C_out, hw)

    # ---- DenseNet concat: two lane-dense slice stores, raw x passthrough ----------
    out_ref[:c_out, :] = acc.astype(out_ref.dtype)
    out_ref[c_out:, :] = x_ref[...].astype(out_ref.dtype)


def dense_layer_forward(x, params):
    """DenseLayer forward. x: (N, C_in, H, W) -> (N, growth_rate + C_in, H, W)."""
    g1, b1, m1, v1, w1, g2, b2, m2, v2, w2 = params
    n, c_in, h, w = x.shape
    c_mid = w1.shape[0]
    c_out = w2.shape[0]
    c_tot = c_out + c_in

    # Fold inference-mode BatchNorm into per-channel scale/shift; fold BN2 scale into w1.
    s1 = (g1 / jnp.sqrt(v1 + _EPS)).astype(jnp.float32)
    o1 = (b1 - m1 * s1).astype(jnp.float32)
    s2 = g2 / jnp.sqrt(v2 + _EPS)
    o2 = (b2 - m2 * s2).astype(jnp.float32)
    # (C_mid, C_in) 1x1 weights, bf16 for the MXU.
    w1_mat = (w1[:, :, 0, 0] * s2[:, None]).astype(jnp.bfloat16)
    # (3, C_out, 3*C_mid): [dy, o, dx*C_mid + c], K-stacked over dx, bf16 for the MXU.
    w2_stack = jnp.transpose(w2, (2, 0, 3, 1)).reshape(3, c_out, 3 * c_mid)
    w2_stack = w2_stack.astype(jnp.bfloat16)

    tile_h = _pick_tile_h(h, w)
    n_hb = h // tile_h

    x_flat = x.reshape(n, c_in, h * w)        # free metadata reshape, stays NCHW

    # 1-row halos per H row-block (zeros at the image boundary; the kernel re-zeros the
    # corresponding `mid` rows anyway, the zeros just keep the DMA'd data defined).
    zrow = jnp.zeros((n, 1, c_in, w), x.dtype)
    if n_hb > 1:
        top_rows = jnp.transpose(x[:, :, tile_h - 1:h - 1:tile_h, :], (0, 2, 1, 3))
        bot_rows = jnp.transpose(x[:, :, tile_h:h:tile_h, :], (0, 2, 1, 3))
        halo_top = jnp.concatenate([zrow, top_rows], axis=1)          # (n, n_hb, C_in, W)
        halo_bot = jnp.concatenate([bot_rows, zrow], axis=1)          # (n, n_hb, C_in, W)
    else:
        halo_top = zrow
        halo_bot = zrow

    out_flat = pl.pallas_call(
        _dense_layer_kernel,
        out_shape=jax.ShapeDtypeStruct((n, c_tot, h * w), x.dtype),
        grid=(n, n_hb),
        in_specs=[
            pl.BlockSpec((None, c_in, tile_h * w), lambda b, hb: (b, 0, hb)),
            pl.BlockSpec((None, 1, c_in, w), lambda b, hb: (b, hb, 0, 0)),
            pl.BlockSpec((None, 1, c_in, w), lambda b, hb: (b, hb, 0, 0)),
            pl.BlockSpec((c_in, 1), lambda b, hb: (0, 0)),
            pl.BlockSpec((c_in, 1), lambda b, hb: (0, 0)),
            pl.BlockSpec((c_mid, c_in), lambda b, hb: (0, 0)),
            pl.BlockSpec((c_mid, 1), lambda b, hb: (0, 0)),
            pl.BlockSpec((3, c_out, 3 * c_mid), lambda b, hb: (0, 0, 0)),
        ],
        out_specs=pl.BlockSpec((None, c_tot, tile_h * w), lambda b, hb: (b, 0, hb)),
        # Per-step VMEM (double-buffered x/out blocks + weights) is a few hundred KB at
        # these sizes and stays far below the v7x 64 MiB budget at DenseNet scale, so the
        # default scoped VMEM limit is sufficient.
        compiler_params=pltpu.CompilerParams(
            dimension_semantics=("parallel", "parallel")),
    )(x_flat, halo_top, halo_bot,
      s1.reshape(c_in, 1), o1.reshape(c_in, 1), w1_mat,
      o2.reshape(c_mid, 1), w2_stack)

    return out_flat.reshape(n, c_tot, h, w)   # free metadata reshape (already NCHW)


def _reference(x, params):
    """Pure-JAX reference: same math as the torch module in eval mode, act = ReLU."""
    g1, b1, m1, v1, w1, g2, b2, m2, v2, w2 = params

    def bn(y, g, b, m, v):
        s = (g / jnp.sqrt(v + _EPS))[None, :, None, None]
        return (y - m[None, :, None, None]) * s + b[None, :, None, None]

    h = jax.nn.relu(bn(x, g1, b1, m1, v1))
    mid = lax.conv_general_dilated(h, w1, window_strides=(1, 1), padding="VALID",
                                   dimension_numbers=("NCHW", "OIHW", "NCHW"))
    mid = jax.nn.relu(bn(mid, g2, b2, m2, v2))
    out = lax.conv_general_dilated(mid, w2, window_strides=(1, 1),
                                   padding=((1, 1), (1, 1)),
                                   dimension_numbers=("NCHW", "OIHW", "NCHW"))
    return jnp.concatenate([out, x], axis=1)


if __name__ == "__main__":
    N, C_IN, H, W = 2, 16, 16, 16
    BN_SIZE, GROWTH = 2, 16
    C_MID, C_OUT = BN_SIZE * GROWTH, GROWTH

    key = jax.random.PRNGKey(0)
    ks = jax.random.split(key, 11)
    x = jax.random.normal(ks[0], (N, C_IN, H, W), jnp.float32)
    params = (
        1.0 + 0.1 * jax.random.normal(ks[1], (C_IN,), jnp.float32),    # bn1 gamma
        0.1 * jax.random.normal(ks[2], (C_IN,), jnp.float32),          # bn1 beta
        0.1 * jax.random.normal(ks[3], (C_IN,), jnp.float32),          # bn1 running_mean
        1.0 + 0.1 * jax.random.uniform(ks[4], (C_IN,), jnp.float32),   # bn1 running_var
        jax.random.normal(ks[5], (C_MID, C_IN, 1, 1), jnp.float32) / jnp.sqrt(C_IN),
        1.0 + 0.1 * jax.random.normal(ks[6], (C_MID,), jnp.float32),   # bn2 gamma
        0.1 * jax.random.normal(ks[7], (C_MID,), jnp.float32),         # bn2 beta
        0.1 * jax.random.normal(ks[8], (C_MID,), jnp.float32),         # bn2 running_mean
        1.0 + 0.1 * jax.random.uniform(ks[9], (C_MID,), jnp.float32),  # bn2 running_var
        jax.random.normal(ks[10], (C_OUT, C_MID, 3, 3), jnp.float32) / jnp.sqrt(9 * C_MID),
    )

    out = jax.block_until_ready(jax.jit(dense_layer_forward)(x, params))
    ref = _reference(x, params)

    assert out.shape == (N, C_OUT + C_IN, H, W), out.shape
    max_err = float(jnp.max(jnp.abs(out - ref)))
    assert jnp.allclose(out, ref, atol=3e-2, rtol=3e-2), f"max abs err = {max_err}"
    print("KERNEL_OK")
</pallas_src>

<mosaic_0001>
module attributes {stable_mosaic.version = 11 : i64} {
  func.func @_dense_layer_kernel(%arg0: i32, %arg1: i32, %arg2: memref<1x16x128xf32, #tpu.memory_space<vmem>>, %arg3: memref<1x1x16x16xf32, #tpu.memory_space<vmem>>, %arg4: memref<1x1x16x16xf32, #tpu.memory_space<vmem>>, %arg5: memref<16x1xf32, #tpu.memory_space<vmem>>, %arg6: memref<16x1xf32, #tpu.memory_space<vmem>>, %arg7: memref<32x16xbf16, #tpu.memory_space<vmem>>, %arg8: memref<32x1xf32, #tpu.memory_space<vmem>>, %arg9: memref<3x16x96xbf16, #tpu.memory_space<vmem>>, %arg10: memref<1x32x128xf32, #tpu.memory_space<vmem>>) attributes {dimension_semantics = [#tpu.dimension_semantics<parallel>, #tpu.dimension_semantics<parallel>], iteration_bounds = array<i64: 2, 2>, scalar_prefetch = 0 : i64, scratch_operands = 0 : i64, tpu.core_type = #tpu.core_type<tc>, window_params = [{transform_indices = @transform_0, window_bounds = array<i64: 1, 16, 128>}, {transform_indices = @transform_1, window_bounds = array<i64: 1, 1, 16, 16>}, {transform_indices = @transform_2, window_bounds = array<i64: 1, 1, 16, 16>}, {pipeline_mode = #tpu.pipeline_mode<synchronous>, transform_indices = @transform_3, window_bounds = array<i64: 16, 1>}, {pipeline_mode = #tpu.pipeline_mode<synchronous>, transform_indices = @transform_4, window_bounds = array<i64: 16, 1>}, {pipeline_mode = #tpu.pipeline_mode<synchronous>, transform_indices = @transform_5, window_bounds = array<i64: 32, 16>}, {pipeline_mode = #tpu.pipeline_mode<synchronous>, transform_indices = @transform_6, window_bounds = array<i64: 32, 1>}, {pipeline_mode = #tpu.pipeline_mode<synchronous>, transform_indices = @transform_7, window_bounds = array<i64: 3, 16, 96>}, {transform_indices = @transform_8, window_bounds = array<i64: 1, 32, 128>}]} {
    %c0 = arith.constant 0 : index
    %c0_0 = arith.constant 0 : index
    %c0_1 = arith.constant 0 : index
    %c0_2 = arith.constant 0 : index
    %0 = vector.load %arg3[%c0, %c0_0, %c0_1, %c0_2] : memref<1x1x16x16xf32, #tpu.memory_space<vmem>>, vector<1x1x16x16xf32>
    %1 = vector.shape_cast %0 : vector<1x1x16x16xf32> to vector<16x16xf32>
    %c0_3 = arith.constant 0 : index
    %c0_4 = arith.constant 0 : index
    %c0_5 = arith.constant 0 : index
    %2 = vector.load %arg2[%c0_3, %c0_4, %c0_5] : memref<1x16x128xf32, #tpu.memory_space<vmem>>, vector<1x16x128xf32>
    %3 = vector.shape_cast %2 : vector<1x16x128xf32> to vector<16x128xf32>
    %c0_6 = arith.constant 0 : index
    %c0_7 = arith.constant 0 : index
    %c0_8 = arith.constant 0 : index
    %c0_9 = arith.constant 0 : index
    %4 = vector.load %arg4[%c0_6, %c0_7, %c0_8, %c0_9] : memref<1x1x16x16xf32, #tpu.memory_space<vmem>>, vector<1x1x16x16xf32>
    %5 = vector.shape_cast %4 : vector<1x1x16x16xf32> to vector<16x16xf32>
    %6 = tpu.concatenate %1, %3, %5 in 1 : vector<16x16xf32>, vector<16x128xf32>, vector<16x16xf32> -> vector<16x160xf32>
    %c0_10 = arith.constant 0 : index
    %c0_11 = arith.constant 0 : index
    %7 = vector.load %arg5[%c0_10, %c0_11] : memref<16x1xf32, #tpu.memory_space<vmem>>, vector<16x1xf32>
    %8 = vector.broadcast %7 : vector<16x1xf32> to vector<16x160xf32>
    %9 = arith.mulf %6, %8 : vector<16x160xf32>
    %c0_12 = arith.constant 0 : index
    %c0_13 = arith.constant 0 : index
    %10 = vector.load %arg6[%c0_12, %c0_13] : memref<16x1xf32, #tpu.memory_space<vmem>>, vector<16x1xf32>
    %11 = vector.broadcast %10 : vector<16x1xf32> to vector<16x160xf32>
    %12 = arith.addf %9, %11 : vector<16x160xf32>
    %cst = arith.constant 0.000000e+00 : f32
    %13 = vector.broadcast %cst : f32 to vector<16x160xf32>
    %14 = arith.maximumf %12, %13 : vector<16x160xf32>
    %c0_14 = arith.constant 0 : index
    %c0_15 = arith.constant 0 : index
    %15 = vector.load %arg7[%c0_14, %c0_15] : memref<32x16xbf16, #tpu.memory_space<vmem>>, vector<32x16xbf16>
    %16 = arith.truncf %14 : vector<16x160xf32> to vector<16x160xbf16>
    %cst_16 = arith.constant dense<0.000000e+00> : vector<32x160xf32>
    %17 = tpu.matmul %15, %16, %cst_16 {dimension_numbers = #tpu.dot_dimension_numbers<[1], [0], [0], [1], [0, 0, 1, 1], [], []>} : vector<32x16xbf16>, vector<16x160xbf16>, vector<32x160xf32> -> vector<32x160xf32>
    %c0_17 = arith.constant 0 : index
    %c0_18 = arith.constant 0 : index
    %18 = vector.load %arg8[%c0_17, %c0_18] : memref<32x1xf32, #tpu.memory_space<vmem>>, vector<32x1xf32>
    %19 = vector.broadcast %18 : vector<32x1xf32> to vector<32x160xf32>
    %20 = arith.addf %17, %19 : vector<32x160xf32>
    %cst_19 = arith.constant 0.000000e+00 : f32
    %21 = vector.broadcast %cst_19 : f32 to vector<32x160xf32>
    %22 = arith.maximumf %20, %21 : vector<32x160xf32>
    %23 = tpu.iota {dimensions = array<i32: 1>} : vector<1x160xi32>
    %c16_i32 = arith.constant 16 : i32
    %24 = vector.broadcast %c16_i32 : i32 to vector<1x160xi32>
    %25 = arith.cmpi slt, %23, %24 : vector<1x160xi32>
    %c0_i32 = arith.constant 0 : i32
    %26 = arith.cmpi eq, %arg1, %c0_i32 : i32
    %27 = vector.broadcast %26 : i1 to vector<1x160xi1>
    %28 = arith.andi %25, %27 : vector<1x160xi1>
    %c144_i32 = arith.constant 144 : i32
    %29 = vector.broadcast %c144_i32 : i32 to vector<1x160xi32>
    %30 = arith.cmpi sge, %23, %29 : vector<1x160xi32>
    %c1_i32 = arith.constant 1 : i32
    %31 = arith.cmpi eq, %arg1, %c1_i32 : i32
    %32 = vector.broadcast %31 : i1 to vector<1x160xi1>
    %33 = arith.andi %30, %32 : vector<1x160xi1>
    %34 = arith.ori %28, %33 : vector<1x160xi1>
    %cst_20 = arith.constant 0.000000e+00 : f32
    %35 = vector.shape_cast %34 : vector<1x160xi1> to vector<1x160xi1>
    %36 = vector.broadcast %35 : vector<1x160xi1> to vector<32x160xi1>
    %37 = vector.broadcast %cst_20 : f32 to vector<32x160xf32>
    %38 = arith.select %36, %37, %22 : vector<32x160xi1>, vector<32x160xf32>
    %39 = tpu.iota {dimensions = array<i32: 1>} : vector<1x128xi32>
    %c16_i32_21 = arith.constant 16 : i32
    %c0_i32_22 = arith.constant 0 : i32
    %40 = arith.cmpi eq, %c16_i32_21, %c0_i32_22 : i32
    %c1_i32_23 = arith.constant 1 : i32
    %41 = arith.select %40, %c1_i32_23, %c16_i32_21 : i32
    %42 = vector.broadcast %41 : i32 to vector<1x128xi32>
    %43 = arith.remsi %39, %42 : vector<1x128xi32>
    %c0_i32_24 = arith.constant 0 : i32
    %44 = vector.broadcast %c0_i32_24 : i32 to vector<1x128xi32>
    %45 = arith.cmpi ne, %43, %44 : vector<1x128xi32>
    %c0_i32_25 = arith.constant 0 : i32
    %46 = vector.broadcast %c0_i32_25 : i32 to vector<1x128xi32>
    %47 = arith.cmpi slt, %43, %46 : vector<1x128xi32>
    %c0_i32_26 = arith.constant 0 : i32
    %48 = arith.cmpi slt, %41, %c0_i32_26 : i32
    %49 = vector.broadcast %48 : i1 to vector<1x128xi1>
    %50 = vector.broadcast %49 : vector<1x128xi1> to vector<1x128xi1>
    %51 = arith.xori %47, %50 : vector<1x128xi1>
    %52 = arith.andi %51, %45 : vector<1x128xi1>
    %53 = vector.broadcast %41 : i32 to vector<1x128xi32>
    %54 = arith.addi %43, %53 : vector<1x128xi32>
    %55 = arith.select %52, %54, %43 : vector<1x128xi1>, vector<1x128xi32>
    %c0_i32_27 = arith.constant 0 : i32
    %56 = vector.broadcast %c0_i32_27 : i32 to vector<1x128xi32>
    %57 = arith.cmpi ne, %55, %56 : vector<1x128xi32>
    %c15_i32 = arith.constant 15 : i32
    %58 = vector.broadcast %c15_i32 : i32 to vector<1x128xi32>
    %59 = arith.cmpi ne, %55, %58 : vector<1x128xi32>
    %cst_28 = arith.constant 0.000000e+00 : f32
    %60 = vector.broadcast %cst_28 : f32 to vector<32x1xf32>
    %61 = tpu.concatenate %60, %38, %60 in 1 : vector<32x1xf32>, vector<32x160xf32>, vector<32x1xf32> -> vector<32x162xf32>
    %62 = vector.extract_strided_slice %61 {offsets = [0, 0], sizes = [32, 128], strides = [1, 1]} : vector<32x162xf32> to vector<32x128xf32>
    %cst_29 = arith.constant 0.000000e+00 : f32
    %63 = vector.shape_cast %57 : vector<1x128xi1> to vector<1x128xi1>
    %64 = vector.broadcast %63 : vector<1x128xi1> to vector<32x128xi1>
    %65 = vector.broadcast %cst_29 : f32 to vector<32x128xf32>
    %66 = arith.select %64, %62, %65 : vector<32x128xi1>, vector<32x128xf32>
    %67 = vector.extract_strided_slice %61 {offsets = [0, 1], sizes = [32, 128], strides = [1, 1]} : vector<32x162xf32> to vector<32x128xf32>
    %68 = vector.extract_strided_slice %61 {offsets = [0, 2], sizes = [32, 128], strides = [1, 1]} : vector<32x162xf32> to vector<32x128xf32>
    %cst_30 = arith.constant 0.000000e+00 : f32
    %69 = vector.shape_cast %59 : vector<1x128xi1> to vector<1x128xi1>
    %70 = vector.broadcast %69 : vector<1x128xi1> to vector<32x128xi1>
    %71 = vector.broadcast %cst_30 : f32 to vector<32x128xf32>
    %72 = arith.select %70, %68, %71 : vector<32x128xi1>, vector<32x128xf32>
    %73 = tpu.concatenate %66, %67, %72 in 0 : vector<32x128xf32>, vector<32x128xf32>, vector<32x128xf32> -> vector<96x128xf32>
    %74 = arith.truncf %73 : vector<96x128xf32> to vector<96x128xbf16>
    %c0_31 = arith.constant 0 : index
    %c0_32 = arith.constant 0 : index
    %c0_33 = arith.constant 0 : index
    %75 = vector.load %arg9[%c0_31, %c0_32, %c0_33] : memref<3x16x96xbf16, #tpu.memory_space<vmem>>, vector<1x16x96xbf16>
    %76 = vector.shape_cast %75 : vector<1x16x96xbf16> to vector<16x96xbf16>
    %cst_34 = arith.constant dense<0.000000e+00> : vector<16x128xf32>
    %77 = tpu.matmul %76, %74, %cst_34 {dimension_numbers = #tpu.dot_dimension_numbers<[1], [0], [0], [1], [0, 0, 1, 1], [], []>} : vector<16x96xbf16>, vector<96x128xbf16>, vector<16x128xf32> -> vector<16x128xf32>
    %78 = vector.extract_strided_slice %61 {offsets = [0, 16], sizes = [32, 128], strides = [1, 1]} : vector<32x162xf32> to vector<32x128xf32>
    %cst_35 = arith.constant 0.000000e+00 : f32
    %79 = vector.shape_cast %57 : vector<1x128xi1> to vector<1x128xi1>
    %80 = vector.broadcast %79 : vector<1x128xi1> to vector<32x128xi1>
    %81 = vector.broadcast %cst_35 : f32 to vector<32x128xf32>
    %82 = arith.select %80, %78, %81 : vector<32x128xi1>, vector<32x128xf32>
    %83 = vector.extract_strided_slice %61 {offsets = [0, 17], sizes = [32, 128], strides = [1, 1]} : vector<32x162xf32> to vector<32x128xf32>
    %84 = vector.extract_strided_slice %61 {offsets = [0, 18], sizes = [32, 128], strides = [1, 1]} : vector<32x162xf32> to vector<32x128xf32>
    %cst_36 = arith.constant 0.000000e+00 : f32
    %85 = vector.shape_cast %59 : vector<1x128xi1> to vector<1x128xi1>
    %86 = vector.broadcast %85 : vector<1x128xi1> to vector<32x128xi1>
    %87 = vector.broadcast %cst_36 : f32 to vector<32x128xf32>
    %88 = arith.select %86, %84, %87 : vector<32x128xi1>, vector<32x128xf32>
    %89 = tpu.concatenate %82, %83, %88 in 0 : vector<32x128xf32>, vector<32x128xf32>, vector<32x128xf32> -> vector<96x128xf32>
    %90 = arith.truncf %89 : vector<96x128xf32> to vector<96x128xbf16>
    %c1 = arith.constant 1 : index
    %c0_37 = arith.constant 0 : index
    %c0_38 = arith.constant 0 : index
    %91 = vector.load %arg9[%c1, %c0_37, %c0_38] : memref<3x16x96xbf16, #tpu.memory_space<vmem>>, vector<1x16x96xbf16>
    %92 = vector.shape_cast %91 : vector<1x16x96xbf16> to vector<16x96xbf16>
    %cst_39 = arith.constant dense<0.000000e+00> : vector<16x128xf32>
    %93 = tpu.matmul %92, %90, %cst_39 {dimension_numbers = #tpu.dot_dimension_numbers<[1], [0], [0], [1], [0, 0, 1, 1], [], []>} : vector<16x96xbf16>, vector<96x128xbf16>, vector<16x128xf32> -> vector<16x128xf32>
    %94 = arith.addf %77, %93 : vector<16x128xf32>
    %95 = vector.extract_strided_slice %61 {offsets = [0, 32], sizes = [32, 128], strides = [1, 1]} : vector<32x162xf32> to vector<32x128xf32>
    %cst_40 = arith.constant 0.000000e+00 : f32
    %96 = vector.shape_cast %57 : vector<1x128xi1> to vector<1x128xi1>
    %97 = vector.broadcast %96 : vector<1x128xi1> to vector<32x128xi1>
    %98 = vector.broadcast %cst_40 : f32 to vector<32x128xf32>
    %99 = arith.select %97, %95, %98 : vector<32x128xi1>, vector<32x128xf32>
    %100 = vector.extract_strided_slice %61 {offsets = [0, 33], sizes = [32, 128], strides = [1, 1]} : vector<32x162xf32> to vector<32x128xf32>
    %101 = vector.extract_strided_slice %61 {offsets = [0, 34], sizes = [32, 128], strides = [1, 1]} : vector<32x162xf32> to vector<32x128xf32>
    %cst_41 = arith.constant 0.000000e+00 : f32
    %102 = vector.shape_cast %59 : vector<1x128xi1> to vector<1x128xi1>
    %103 = vector.broadcast %102 : vector<1x128xi1> to vector<32x128xi1>
    %104 = vector.broadcast %cst_41 : f32 to vector<32x128xf32>
    %105 = arith.select %103, %101, %104 : vector<32x128xi1>, vector<32x128xf32>
    %106 = tpu.concatenate %99, %100, %105 in 0 : vector<32x128xf32>, vector<32x128xf32>, vector<32x128xf32> -> vector<96x128xf32>
    %107 = arith.truncf %106 : vector<96x128xf32> to vector<96x128xbf16>
    %c2 = arith.constant 2 : index
    %c0_42 = arith.constant 0 : index
    %c0_43 = arith.constant 0 : index
    %108 = vector.load %arg9[%c2, %c0_42, %c0_43] : memref<3x16x96xbf16, #tpu.memory_space<vmem>>, vector<1x16x96xbf16>
    %109 = vector.shape_cast %108 : vector<1x16x96xbf16> to vector<16x96xbf16>
    %cst_44 = arith.constant dense<0.000000e+00> : vector<16x128xf32>
    %110 = tpu.matmul %109, %107, %cst_44 {dimension_numbers = #tpu.dot_dimension_numbers<[1], [0], [0], [1], [0, 0, 1, 1], [], []>} : vector<16x96xbf16>, vector<96x128xbf16>, vector<16x128xf32> -> vector<16x128xf32>
    %111 = arith.addf %94, %110 : vector<16x128xf32>
    %c0_45 = arith.constant 0 : index
    %c0_46 = arith.constant 0 : index
    %c0_47 = arith.constant 0 : index
    %112 = vector.load %arg10[%c0_45, %c0_46, %c0_47] : memref<1x32x128xf32, #tpu.memory_space<vmem>>, vector<1x16x128xf32>
    %113 = vector.shape_cast %112 : vector<1x16x128xf32> to vector<16x128xf32>
    %114 = vector.shape_cast %111 : vector<16x128xf32> to vector<1x16x128xf32>
    tpu.vector_store %arg10[%c0_45, %c0_46, %c0_47], %114 {strides = array<i32>} : memref<1x32x128xf32, #tpu.memory_space<vmem>>, vector<1x16x128xf32>,
    %c0_48 = arith.constant 0 : index
    %c0_49 = arith.constant 0 : index
    %c0_50 = arith.constant 0 : index
    %115 = vector.load %arg2[%c0_48, %c0_49, %c0_50] : memref<1x16x128xf32, #tpu.memory_space<vmem>>, vector<1x16x128xf32>
    %116 = vector.shape_cast %115 : vector<1x16x128xf32> to vector<16x128xf32>
    %c0_51 = arith.constant 0 : index
    %c16 = arith.constant 16 : index
    %c0_52 = arith.constant 0 : index
    %117 = vector.load %arg10[%c0_51, %c16, %c0_52] : memref<1x32x128xf32, #tpu.memory_space<vmem>>, vector<1x16x128xf32>
    %118 = vector.shape_cast %117 : vector<1x16x128xf32> to vector<16x128xf32>
    %119 = vector.shape_cast %116 : vector<16x128xf32> to vector<1x16x128xf32>
    tpu.vector_store %arg10[%c0_51, %c16, %c0_52], %119 {strides = array<i32>} : memref<1x32x128xf32, #tpu.memory_space<vmem>>, vector<1x16x128xf32>,
    return
  }
  func.func @transform_0(%arg0: i32, %arg1: i32) -> (i32, i32, i32) {
    %c0_i32 = arith.constant 0 : i32
    %c0_i32_0 = arith.constant 0 : i32
    return %arg0, %c0_i32, %arg1 : i32, i32, i32
  }
  func.func @transform_1(%arg0: i32, %arg1: i32) -> (i32, i32, i32, i32) {
    %c0_i32 = arith.constant 0 : i32
    %c0_i32_0 = arith.constant 0 : i32
    %c0_i32_1 = arith.constant 0 : i32
    return %arg0, %arg1, %c0_i32, %c0_i32_0 : i32, i32, i32, i32
  }
  func.func @transform_2(%arg0: i32, %arg1: i32) -> (i32, i32, i32, i32) {
    %c0_i32 = arith.constant 0 : i32
    %c0_i32_0 = arith.constant 0 : i32
    %c0_i32_1 = arith.constant 0 : i32
    return %arg0, %arg1, %c0_i32, %c0_i32_0 : i32, i32, i32, i32
  }
  func.func @transform_3(%arg0: i32, %arg1: i32) -> (i32, i32) {
    %c0_i32 = arith.constant 0 : i32
    %c0_i32_0 = arith.constant 0 : i32
    %c0_i32_1 = arith.constant 0 : i32
    return %c0_i32, %c0_i32_0 : i32, i32
  }
  func.func @transform_4(%arg0: i32, %arg1: i32) -> (i32, i32) {
    %c0_i32 = arith.constant 0 : i32
    %c0_i32_0 = arith.constant 0 : i32
    %c0_i32_1 = arith.constant 0 : i32
    return %c0_i32, %c0_i32_0 : i32, i32
  }
  func.func @transform_5(%arg0: i32, %arg1: i32) -> (i32, i32) {
    %c0_i32 = arith.constant 0 : i32
    %c0_i32_0 = arith.constant 0 : i32
    %c0_i32_1 = arith.constant 0 : i32
    return %c0_i32, %c0_i32_0 : i32, i32
  }
  func.func @transform_6(%arg0: i32, %arg1: i32) -> (i32, i32) {
    %c0_i32 = arith.constant 0 : i32
    %c0_i32_0 = arith.constant 0 : i32
    %c0_i32_1 = arith.constant 0 : i32
    return %c0_i32, %c0_i32_0 : i32, i32
  }
  func.func @transform_7(%arg0: i32, %arg1: i32) -> (i32, i32, i32) {
    %c0_i32 = arith.constant 0 : i32
    %c0_i32_0 = arith.constant 0 : i32
    %c0_i32_1 = arith.constant 0 : i32
    %c0_i32_2 = arith.constant 0 : i32
    return %c0_i32, %c0_i32_0, %c0_i32_1 : i32, i32, i32
  }
  func.func @transform_8(%arg0: i32, %arg1: i32) -> (i32, i32, i32) {
    %c0_i32 = arith.constant 0 : i32
    %c0_i32_0 = arith.constant 0 : i32
    return %arg0, %c0_i32, %arg1 : i32, i32, i32
  }
}

</mosaic_0001>

<bundles_post_ra>
// kernel: dense_layer_forward.1
= control target key start
LH: loop header
LB: loop body
LE: loop exit
PB: predicated region body
PF: predicated region fallthrough
CT: control target
= control target key end

     0   :  { %s2151_s0 = inlined_call_operand.vmem [shape: f32[2,16,256], index: 0, kind: input, shape index: {}]   ;;  %s2152_s1 = inlined_call_operand.vmem [shape: f32[2,2,16,16], index: 1, kind: input, shape index: {}]   ;;  %s2153_s2 = inlined_call_operand.vmem [shape: f32[2,2,16,16], index: 2, kind: input, shape index: {}]   ;;  %s2154_s3 = inlined_call_operand.vmem [shape: f32[16,1], index: 3, kind: input, shape index: {}]   ;;  %s2155_s4 = inlined_call_operand.vmem [shape: f32[16,1], index: 4, kind: input, shape index: {}]   ;;  %s2156_s5 = inlined_call_operand.vmem [shape: bf16[32,16], index: 5, kind: input, shape index: {}]   ;;  %s2157_s6 = inlined_call_operand.vmem [shape: f32[32,1], index: 6, kind: input, shape index: {}]   ;;  %s2158_s7 = inlined_call_operand.vmem [shape: bf16[3,16,96], index: 7, kind: input, shape index: {}]   ;;  %s2159_s8 = inlined_call_operand.vmem [shape: f32[2,32,256], index: 8, kind: output, shape index: {}]  }
   0x1   :  { %2161 = sst [smem:[#allocation4_spill]] %s2151_s0 }
   0x2   :  { %s1790_s27 = smov 0   ;;  %s1792_s28 = smov 0  }
   0x3   :  { %s1794_s29 = smov 0   ;;  %s1796_s30 = smov 0  }
   0x4   :  { %s1798_s9 = smov 0   ;;  %s1800_s10 = smov 0  }
   0x5   :  { %s1802_s11 = smov 0  }
   0x6 LB: > { %s27_s12 = sadd.s32 1, %s1722_s9  ;;  %s30_s13 = sadd.s32 1, %s1726_s10  ;;  %s1730_s11 = sphi %s1802_s11, %s18_s11   ;;  %s1726_s10 = sphi %s1800_s10, %s2178_s10   ;;  %s1722_s9 = sphi %s1798_s9, %s2177_s9   ;;  %s1718_s30 = sphi %s1796_s30, %s2176_s30   ;;  %s1714_s29 = sphi %s1794_s29, %s2175_s29   ;;  %s1710_s28 = sphi %s1792_s28, %s2174_s28   ;;  %s1706_s27 = sphi %s1790_s27, %s2173_s27  }
   0x7   : > { %p28_p0 = scmp.ge.s32.totalorder %s27_s12, 2  ;;  %s1274_s14 = sadd.s32 4294967295, %s1730_s11  }
   0x8   : > { %p46_p1 = scmp.ne.s32.totalorder %s1710_s28, %s1706_s27  ;;  %p47_p2 = scmp.eq.s32.totalorder %s1730_s11, 0 }
   0x9   : > { %s2180_s12 = smov (%p28_p0, %s27_s12), 0  ;;  %s2182_s13 = smov (!%p28_p0, %s30_s13), %s1726_s10 }
   0xa   : > { %p32_p3 = scmp.ge.s32.totalorder %s2182_s13, 2  ;;  %p239_p4 = scmp.eq.s32.totalorder %s1274_s14, 3 }
   0xb   : > { %s35_s15 = ssub.s32 %s1722_s9, %s2180_s12  ;;  %p48_p5 = por %p47_p2, %p46_p1 }
   0xc   : > { %s2184_s13 = smov (%p32_p3, %s2182_s13), 0  ;;  %p1838_p6 = por %p239_p4, %p46_p1 }
   0xd   : > { %s34_s17 = ssub.s32 %s1726_s10, %s2184_s13  ;;  %s39_s19 = sadd.s32 1, %s1710_s28 }
   0xe   : > { %s36_s18 = sor.u32 %s35_s15, %s34_s17  ;;  %p1277_p8 = scmp.ge.s32.totalorder %s1730_s11, 4 }
   0xf   : > { %p37_p7 = scmp.eq.s32.totalorder %s36_s18, 0 }
  0x10   : > { %276 = sbr.rel (%p1277_p8) target bundleno = 34 (0x22), region = 36 }
  0x11   : > { %s1846_s20 = scalar_select %p37_p7, %s1710_s28, %s39_s19  }
  0x17   : > { %279 = sbr.rel (!%p48_p5) target bundleno = 34 (0x22), region = 40  ;;  %s281_s21 = sand.u32 (%p48_p5), 1, %s1710_s28  }
  0x18   : > { %s1279_s22 = sshll.u32 (%p48_p5), %s1726_s10, 2  ;;  %s1278_s23 = sshll.u32 (%p48_p5), %s281_s21, 4 }
  0x19   : > { %s285_s24 = sadd.s32 (%p48_p5), %s1722_s9, %s1279_s22  ;;  %s2163_s0 = sld [smem:[#allocation4_spill]] (%p48_p5) }
  0x1a   : > { %s1280_s25 = sshll.u32 (%p48_p5), %s285_s24, 3  ;;  %s283_s17 = scalar_lea.vmem (%p48_p5), [#allocation2], %s1278_s23 }
  0x1f   : > { %s287_s15 = scalar_lea.vmem %s2163_s0, %s1280_s25 }
  0x20   : > { %v317_v0 = vld [vmem:[%s287_s15] sm:$0xff]  ;;  %v319_v1 = vld [vmem:[%s287_s15 + $0x10] sm:$0xff] }
  0x21   : > { %318 = vst [vmem:[%s283_s17] sm:$0xff] %v317_v0  ;;  %320 = vst [vmem:[%s283_s17 + $0x8] sm:$0xff] %v319_v1 }
  0x22 PF: > { %p1281_p9 = scmp.ge.s32.totalorder %s1730_s11, 1  ;;  %p349_p10 = scmp.lt.s32.totalorder %s1730_s11, 5 }
  0x24   : > { %p350_p11 = pnand %p1281_p9, %p349_p10 }
  0x25   : > { %v468_v2 = vld [vmem:[%s2155_s4] sm:$0xff] (!%p350_p11)  ;;  %s2160_s23 = sand.u32 (!%p350_p11), 1, %s1706_s27   ;;  %v1732_v4 = vmov (!%p350_p11), 0   ;;  %p406_p12 = scmp.lt.s32.totalorder (!%p350_p11), %s1718_s30, 1  ;;  %v469_v5 = vld [vmem:[%s2155_s4 + $0x8] sm:$0xff] (!%p350_p11)  ;;  %v497_v13 = vld [vmem:[%s2157_s6 + $0x18] sm:$0xff] (!%p350_p11)  ;;  %v595_v45 = vlaneseq (!%p350_p11) }
  0x26   : > { %353 = sbr.rel (%p350_p11) target bundleno = 943 (0x3af), region = 86  ;;  %v452_v3 = vld [vmem:[%s2154_s3] sm:$0xff] (!%p350_p11)  ;;  %1490 = vset.pattern.permute.xlu1 (!%p350_p11), %v1732_v4  ;;  %1489 = vset.pattern.permute.xlu0 (!%p350_p11), %v1732_v4  ;;  %s1282_s24 = sshll.u32 (!%p350_p11), %s2160_s23, 4  ;;  %v453_v6 = vld [vmem:[%s2154_s3 + $0x8] sm:$0xff] (!%p350_p11)  ;;  %v496_v14 = vld [vmem:[%s2157_s6 + $0x10] sm:$0xff] (!%p350_p11)  ;;  %vm447_vm0 = vcmask (!%p350_p11), 130048  }
  0x27   : > { %472 = vperm.xlu1 (!%p350_p11), %1490, %v468_v2   ;;  %456 = vperm.xlu0 (!%p350_p11), %1489, %v452_v3   ;;  %p408_p13 = scmp.lt.s32.totalorder (!%p350_p11), %s1714_s29, 1  ;;  %s358_s21 = scalar_lea.vmem (!%p350_p11), [#allocation2], %s1282_s24  ;;  %v495_v11 = vld [vmem:[%s2157_s6 + $0x8] sm:$0xff] (!%p350_p11)  ;;  %v494_v12 = vld [vmem:[%s2157_s6] sm:$0xff] (!%p350_p11)  ;;  %v1918_v46 = vand.u32 (!%p350_p11), 127, %v595_v45  ;;  %v1734_v58 = vmov (!%p350_p11), 0.0  }
  0x28   : > { %566 = vmatprep.mubr.bf16.mxu0 (!%p350_p11), %v1732_v4  ;;  %v1879_v7 = vld [vmem:[%s358_s21 + $0x8] sm:$0xff] (!%p350_p11)  ;;  %v1881_v8 = vld [vmem:[%s358_s21] sm:$0xff] (!%p350_p11)  ;;  %s1733_s15 = smov (!%p350_p11), 16   ;;  %p600_p0 = scmp.eq.s32.totalorder (!%p350_p11), %s1714_s29, 0  ;;  %1382 = vmatprep.subr.bf16.mxu1 (!%p350_p11), %v1734_v58  ;;  %vm666_vm7 = vcmask (!%p350_p11), 7168   ;;  %vm683_vm8 = vcmask (!%p350_p11), 269312  }
  0x29   : > { %v1671_v43 = vld [vmem:[%s2156_s5] sm:$0xff] (!%p350_p11)   ;;  %v1672_v44 = vld [vmem:[%s2156_s5 + $0x8] sm:$0xff] (!%p350_p11)   ;;  %p608_p1 = scmp.eq.s32.totalorder (!%p350_p11), %s1714_s29, 1  ;;  %v597_v48 = vadd.s32 (!%p350_p11), 128, %v1918_v46  ;;  %vm598_vm1 = vcmp.lt.s32.totalorder (!%p350_p11), %v1918_v46, 16  ;;  %s1736_s21 = smov (!%p350_p11), 127  }
  0x2a   : > { %s1738_s26 = smov (!%p350_p11), 112   ;;  %s1742_s24 = smov (!%p350_p11), 110   ;;  %vm1744_vm11 = vmmov (!%p350_p11), 0   ;;  %vm749_vm12 = vcmask (!%p350_p11), 1039360   ;;  %vm782_vm13 = vcmask (!%p350_p11), 916480   ;;  %vm720_vm14 = vcmask (!%p350_p11), 1031168  }
  0x2b   : > { %477 = vperm.xlu1 (!%p350_p11), %1490, %v469_v5   ;;  %461 = vperm.xlu0 (!%p350_p11), %1489, %v453_v6   ;;  %vm607_vm3 = vcmp.ge.s32.totalorder (!%p350_p11), %v597_v48, 144 }
  0x2c   : > { %1394 = vmatprep.mubr.msk.bf16.mxu1 (!%p350_p11), %vm1744_vm11, %v1734_v58 }
  0x2d   : > { %s407_s17 = scalar_select %p406_p12, %s1718_s30, 1 }
  0x2e   : > { %s409_s18 = scalar_select %p408_p13, %s1714_s29, 1 }
  0x2f   : > { %s1285_s19 = sshll.u32 %s407_s17, 2  ;;  %435 = vrot.lane.b32.xlu1 %v1879_v7, %s1733_s15  ;;  %433 = vrot.lane.b32.xlu0 %v1881_v8, %s1733_s15  ;;  %s1743_s17 = smov 94  }
  0x30   : > { %s1284_s22 = sshll.u32 %s409_s18, 1 }
  0x31   : > { %s412_s23 = sadd.s32 %s1285_s19, %s1284_s22  ;;  %s1737_s22 = smov 126  }
  0x32   : > { %s1286_s25 = sshll.u32 %s412_s23, 3  ;;  %s1735_s23 = smov 1  }
  0x33   : > { %s423_s14 = scalar_lea.vmem %s2153_s2, %s1286_s25 }
  0x34   : > { %v430_v9 = vld [vmem:[%s423_s14 + $0x8] sm:$0xff]  ;;  %v429_v10 = vld [vmem:[%s423_s14] sm:$0xff]  ;;  %s601_s19 = scalar_select %p600_p0, 1, 0 }
  0x35   : > { %443 = vrot.lane.b32.xlu1 %v430_v9, %s1733_s15  ;;  %441 = vrot.lane.b32.xlu0 %v429_v10, %s1733_s15  ;;  %s414_s15 = scalar_lea.vmem %s2152_s1, %s1286_s25  ;;  %s1739_s14 = smov 96  }
  0x36   : > { %v426_v19 = vld [vmem:[%s414_s15 + $0x8] sm:$0xff]  ;;  %v425_v20 = vld [vmem:[%s414_s15] sm:$0xff]  ;;  %s609_s0 = scalar_select %p608_p1, 1, 0  ;;  %v602_v47 = vstv %s601_s19 }
  0x37   : > { %vm603_vm2 = vcmp.eq.s32.totalorder %v602_v47, 1  ;;  %s1740_s15 = smov 111   ;;  %s1741_s25 = smov 95  }
  0x38   : > { %v610_v49 = vstv %s609_s0  ;;  %vm1922_vm5 = vmand %vm598_vm1, %vm603_vm2  ;;  %vm863_vm1 = vcmask 785408   ;;  %vm840_vm2 = vcmask 908288  }
  0x39   : > { %505 = vperm.xlu1 %1490, %v495_v11   ;;  %500 = vperm.xlu0 %1489, %v494_v12   ;;  %vm611_vm4 = vcmp.eq.s32.totalorder %v610_v49, 1 }
  0x3a   : > { %vm1928_vm6 = vmand %vm607_vm3, %vm611_vm4  ;;  %vm1030_vm3 = vcmask 777216   ;;  %vm811_vm4 = vcmask 900096  }
  0x3d   : > { %515 = vperm.xlu1 %1490, %v497_v13   ;;  %510 = vperm.xlu0 %1489, %v496_v14  }
  0xa6   : > { %v473_v15 = vpop.permute.xlu1 %472  ;;  %v457_v16 = vpop.permute.xlu0 %456 }
  0xaa   : > { %v478_v17 = vpop.permute.xlu1 %477  ;;  %v462_v18 = vpop.permute.xlu0 %461 }
  0xae   : > { %v436_v21 = vpop.permute.xlu1 %435  ;;  %v434_v22 = vpop.permute.xlu0 %433 }
  0xaf   : > { %v449_v23 = vsel %vm447_vm0, %v426_v19, %v436_v21  ;;  %v448_v24 = vsel %vm447_vm0, %v425_v20, %v434_v22 }
  0xb0   : > { %v466_v25 = vmul.f32 %v462_v18, %v449_v23  ;;  %v464_v26 = vmul.f32 %v457_v16, %v448_v24 }
  0xb2   : > { %v444_v27 = vpop.permute.xlu1 %443  ;;  %v442_v28 = vpop.permute.xlu0 %441  ;;  %v480_v31 = vadd.f32 %v473_v15, %v464_v26  ;;  %v482_v32 = vadd.f32 %v478_v17, %v466_v25 }
  0xb3   : > { %v451_v29 = vsel %vm447_vm0, %v436_v21, %v444_v27  ;;  %v450_v30 = vsel %vm447_vm0, %v434_v22, %v442_v28 }
  0xb4   : > { %v467_v33 = vmul.f32 %v462_v18, %v451_v29  ;;  %v465_v34 = vmul.f32 %v457_v16, %v450_v30  ;;  %v484_v37 = vmax.f32 %v480_v31, 0.0  ;;  %v486_v38 = vmax.f32 %v482_v32, 0.0 }
  0xb5   : > { %v632_v31 = vand.u32 15, %v1918_v46 }
  0xb6   : > { %v481_v35 = vadd.f32 %v473_v15, %v465_v34  ;;  %v483_v36 = vadd.f32 %v478_v17, %v467_v33  ;;  %v492_v42 = vpack.c.bf16 %v486_v38, %v484_v37 }
  0xb7   : > { %vm640_vm9 = vcmp.ne.s32.totalorder %v632_v31, 0  ;;  %vm641_vm15 = vcmp.ne.s32.totalorder %v632_v31, 15 }
  0xb8   : > { %v485_v39 = vmax.f32 %v481_v35, 0.0  ;;  %v487_v40 = vmax.f32 %v483_v36, 0.0  ;;  %v501_v50 = vpop.permute.xlu0 %500  ;;  %v506_v54 = vpop.permute.xlu1 %505  ;;  %vm1956_vm10 = vmpackc.low %vm640_vm9, %vm640_vm9 }
  0xba   : > { %v493_v41 = vpack.c.bf16 %v487_v40, %v485_v39 }
  0xbc   : > { %534 = vmatprep.subr.bf16.mxu0 %v493_v41  ;;  %v511_v9 = vpop.permute.xlu0 %510  ;;  %v516_v15 = vpop.permute.xlu1 %515 }
  0xbd   : > { %535 = vmatpush1.bf16.msra.mxu0 %v492_v42 }
  0xbe   : > { %1366 = vmatprep.subr.bf16.mxu0 %v1734_v58 }
  0xc0   : > { %1292 = vmatmul.mubr.msk.bf16.vlgmr.msra.gmra.mrb[0].mxu0 %vm447_vm0, %v1671_v43 }
  0xc1   : > { %576 = vmatprep.mubr.bf16.mxu0 %v1732_v4 }
  0xc8   : > { %1293 = vmatmul.mubr.msk.bf16.gmra.mrb[4].mxu0 %vm447_vm0, %v1672_v44  ;;  %vm2030_vm0 = vmpackc.low %vm641_vm15, %vm641_vm15 }
  0xc9   : > { %1378 = vmatprep.mubr.msk.bf16.mxu0 %vm1744_vm11, %v1734_v58 }
 0x193   : > { %v568_v51 = vpop.f32.mrb[0].mxu0 }
 0x194   : > { %v569_v52 = vadd.f32 %v568_v51, %v501_v50  ;;  %v570_v53 = vpop.f32.mrb[1].mxu0 }
 0x195   : > { %v571_v56 = vadd.f32 %v570_v53, %v501_v50  ;;  %v572_v57 = vpop.f32.mrb[2].mxu0 }
 0x196   : > { %v587_v59 = vmax.f32 %v569_v52, 0.0  ;;  %v573_v61 = vadd.f32 %v572_v57, %v506_v54  ;;  %v574_v62 = vpop.f32.mrb[3].mxu0 }
 0x197   : > { %v588_v63 = vmax.f32 %v571_v56, 0.0  ;;  %v575_v0 = vadd.f32 %v574_v62, %v506_v54 }
 0x198   : > { %v620_v1 = vsel %vm1922_vm5, 0.0, %v587_v59  ;;  %v589_v2 = vmax.f32 %v573_v61, 0.0 }
 0x199   : > { %v621_v3 = vsel %vm1928_vm6, 0.0, %v588_v63  ;;  %v590_v4 = vmax.f32 %v575_v0, 0.0 }
 0x19a   : > { %v622_v5 = vsel %vm1922_vm5, 0.0, %v589_v2  ;;  %v1491_v6 = vpack.i.bf16 %v621_v3, %v620_v1 }
 0x19b   : > { %v623_v10 = vsel %vm1928_vm6, 0.0, %v590_v4  ;;  %v578_v11 = vpop.f32.mrb[4].mxu0 }
 0x19c   : > { %v579_v12 = vadd.f32 %v578_v11, %v511_v9  ;;  %v580_v13 = vpop.f32.mrb[5].mxu0  ;;  %1492 = vrot.lane.b32.xlu0 %v1491_v6, %s1735_s23  ;;  %v1496_v14 = vpack.i.bf16 %v623_v10, %v622_v5 }
 0x19d   : > { %v581_v16 = vadd.f32 %v580_v13, %v511_v9  ;;  %v582_v17 = vpop.f32.mrb[6].mxu0 }
 0x19e   : > { %v591_v18 = vmax.f32 %v579_v12, 0.0  ;;  %v583_v19 = vadd.f32 %v582_v17, %v516_v15  ;;  %v584_v20 = vpop.f32.mrb[7].mxu0  ;;  %1497 = vrot.lane.b32.xlu1 %v1496_v14, %s1735_s23 }
 0x19f   : > { %v592_v21 = vmax.f32 %v581_v16, 0.0  ;;  %v585_v22 = vadd.f32 %v584_v20, %v516_v15 }
 0x1a0   : > { %v624_v23 = vsel %vm1922_vm5, 0.0, %v591_v18  ;;  %v593_v24 = vmax.f32 %v583_v19, 0.0 }
 0x1a1   : > { %v625_v25 = vsel %vm1928_vm6, 0.0, %v592_v21  ;;  %v594_v26 = vmax.f32 %v585_v22, 0.0 }
 0x1a2   : > { %v626_v27 = vsel %vm1922_vm5, 0.0, %v593_v24  ;;  %v1501_v28 = vpack.i.bf16 %v625_v25, %v624_v23  ;;  %vm1001_vm5 = vcmask 769024  }
 0x1a3   : > { %v627_v29 = vsel %vm1928_vm6, 0.0, %v594_v26 }
 0x1a4   : > { %1502 = vrot.lane.b32.xlu0 %v1501_v28, %s1735_s23  ;;  %v1506_v30 = vpack.i.bf16 %v627_v29, %v626_v27 }
 0x1a6   : > { %1507 = vrot.lane.b32.xlu1 %v1506_v30, %s1735_s23 }
 0x20e   : > { %v1493_v32 = vpop.permute.xlu0 %1492 }
 0x20f   : > { %v1495_v33 = vunpack.i.h.bf16 %v1493_v32  ;;  %v1494_v34 = vunpack.i.l.bf16 %v1493_v32 }
 0x210   : > { %v1498_v35 = vpop.permute.xlu1 %1497 }
 0x211   : > { %v667_v36 = vsel %vm666_vm7, %v1494_v34, %v1495_v33  ;;  %v679_v37 = vsel %vm666_vm7, 0.0, %v1494_v34  ;;  %v1500_v38 = vunpack.i.h.bf16 %v1498_v35  ;;  %v1499_v39 = vunpack.i.l.bf16 %v1498_v35 }
 0x212   : > { %v684_v40 = vsel %vm683_vm8, %v667_v36, 0.0 }
 0x213   : > { %v668_v41 = vsel %vm666_vm7, %v1499_v39, %v1500_v38  ;;  %v680_v42 = vsel %vm666_vm7, 0.0, %v1499_v39  ;;  %v1511_v43 = vpack.i.bf16 %v684_v40, %v679_v37 }
 0x214   : > { %v685_v45 = vsel %vm683_vm8, %v668_v41, 0.0  ;;  %v1312_v47 = vpack.c.bf16 %v680_v42, %v679_v37 }
 0x215   : > { %1512 = vrot.lane.b32.xlu0 %v1511_v43, %s1736_s21  ;;  %v1546_v48 = vpack.i.bf16 %v685_v45, %v680_v42 }
 0x216   : > { %v1503_v49 = vpop.permute.xlu0 %1502  ;;  %1383 = vmatpush3.bf16.msk.msra.mxu1 %vm1956_vm10, %v1312_v47 }
 0x217   : > { %v1504_v50 = vunpack.i.l.bf16 %v1503_v49  ;;  %1547 = vrot.lane.b32.xlu1 %v1546_v48, %s1736_s21  ;;  %1384 = vmatprep.subr.bf16.mxu1 %v1734_v58  ;;  %v1505_v56 = vunpack.i.h.bf16 %v1503_v49 }
 0x218   : > { %v1508_v51 = vpop.permute.xlu1 %1507 }
 0x219   : > { %v1509_v52 = vunpack.i.l.bf16 %v1508_v51  ;;  %1517 = vrot.lane.b32.xlu0 %v1511_v43, %s1737_s22  ;;  %v681_v53 = vsel %vm666_vm7, 0.0, %v1504_v50  ;;  %v1510_v57 = vunpack.i.h.bf16 %v1508_v51  ;;  %v669_v59 = vsel %vm666_vm7, %v1504_v50, %v1505_v56 }
 0x21a   : > { %v686_v61 = vsel %vm683_vm8, %v669_v59, 0.0 }
 0x21b   : > { %v682_v54 = vsel %vm666_vm7, 0.0, %v1509_v52  ;;  %1552 = vrot.lane.b32.xlu1 %v1546_v48, %s1737_s22  ;;  %v670_v60 = vsel %vm666_vm7, %v1509_v52, %v1510_v57  ;;  %v1581_v63 = vpack.i.bf16 %v686_v61, %v681_v53 }
 0x21c   : > { %v1315_v55 = vpack.c.bf16 %v682_v54, %v681_v53  ;;  %v687_v62 = vsel %vm683_vm8, %v670_v60, 0.0 }
 0x21d   : > { %1522 = vrot.lane.b32.xlu0 %v1511_v43, %s1738_s26  ;;  %v1616_v0 = vpack.i.bf16 %v687_v62, %v682_v54 }
 0x21e   : > { %1385 = vmatpush3.bf16.msk.msra.mxu1 %vm1956_vm10, %v1315_v55 }
 0x21f   : > { %1557 = vrot.lane.b32.xlu1 %v1546_v48, %s1738_s26  ;;  %1386 = vmatprep.subr.bf16.mxu1 %v1734_v58 }
 0x221   : > { %1527 = vrot.lane.b32.xlu0 %v1511_v43, %s1739_s14 }
 0x223   : > { %1562 = vrot.lane.b32.xlu1 %v1546_v48, %s1739_s14 }
 0x225   : > { %1532 = vrot.lane.b32.xlu0 %v1511_v43, %s1740_s15 }
 0x227   : > { %1567 = vrot.lane.b32.xlu1 %v1546_v48, %s1740_s15 }
 0x229   : > { %1537 = vrot.lane.b32.xlu0 %v1511_v43, %s1741_s25 }
 0x22b   : > { %1572 = vrot.lane.b32.xlu1 %v1546_v48, %s1741_s25 }
 0x22d   : > { %1542 = vrot.lane.b32.xlu0 %v1511_v43, %s1742_s24 }
 0x22f   : > { %1577 = vrot.lane.b32.xlu1 %v1546_v48, %s1742_s24 }
 0x231   : > { %1582 = vrot.lane.b32.xlu0 %v1581_v63, %s1736_s21 }
 0x233   : > { %1617 = vrot.lane.b32.xlu1 %v1616_v0, %s1736_s21 }
 0x235   : > { %1587 = vrot.lane.b32.xlu0 %v1511_v43, %s1743_s17 }
 0x237   : > { %1622 = vrot.lane.b32.xlu1 %v1546_v48, %s1743_s17 }
 0x239   : > { %1592 = vrot.lane.b32.xlu0 %v1581_v63, %s1737_s22 }
 0x23b   : > { %1632 = vrot.lane.b32.xlu1 %v1616_v0, %s1737_s22 }
 0x23d   : > { %1597 = vrot.lane.b32.xlu0 %v1581_v63, %s1738_s26 }
 0x23f   : > { %1637 = vrot.lane.b32.xlu1 %v1616_v0, %s1738_s26  ;;  %s2172_s26 = sand.u32 1, %s1706_s27   ;;  %s1341_s27 = sshll.u32 (%p1838_p6), %s1718_s30, 3 }
 0x241   : > { %1602 = vrot.lane.b32.xlu0 %v1581_v63, %s1739_s14 }
 0x243   : > { %1642 = vrot.lane.b32.xlu1 %v1616_v0, %s1739_s14  ;;  %s1283_s14 = sshll.u32 %s2172_s26, 5 }
 0x245   : > { %1607 = vrot.lane.b32.xlu0 %v1581_v63, %s1740_s15 }
 0x247   : > { %1647 = vrot.lane.b32.xlu1 %v1616_v0, %s1740_s15  ;;  %s405_s15 = scalar_lea.vmem [#allocation3], %s1283_s14 }
 0x248   : > { %1103 = vst [vmem:[%s405_s15 + $0x10] sm:$0xff] %v1881_v8  ;;  %1104 = vst [vmem:[%s405_s15 + $0x18] sm:$0xff] %v1879_v7 }
 0x249   : > { %1612 = vrot.lane.b32.xlu0 %v1581_v63, %s1741_s25 }
 0x24b   : > { %1652 = vrot.lane.b32.xlu1 %v1616_v0, %s1741_s25  ;;  %s1113_s25 = sadd.s32 (%p1838_p6), %s1714_s29, %s1341_s27 }
 0x24d   : > { %1627 = vrot.lane.b32.xlu0 %v1581_v63, %s1742_s24 }
 0x24f   : > { %1657 = vrot.lane.b32.xlu1 %v1616_v0, %s1742_s24  ;;  %s1342_s24 = sshll.u32 (%p1838_p6), %s1113_s25, 3 }
 0x250   : > { %s1115_s19 = scalar_lea.vmem (%p1838_p6), %s2159_s8, %s1342_s24 }
 0x251   : > { %1662 = vrot.lane.b32.xlu0 %v1581_v63, %s1743_s17 }
 0x253   : > { %1667 = vrot.lane.b32.xlu1 %v1616_v0, %s1743_s17 }
 0x287   : > { %v1513_v1 = vpop.permute.xlu0 %1512 }
 0x288   : > { %v1515_v2 = vunpack.i.h.bf16 %v1513_v1  ;;  %v1514_v3 = vunpack.i.l.bf16 %v1513_v1 }
 0x289   : > { %v1548_v4 = vpop.permute.xlu1 %1547 }
 0x28a   : > { %v1550_v5 = vunpack.i.h.bf16 %v1548_v4  ;;  %v1549_v6 = vunpack.i.l.bf16 %v1548_v4  ;;  %v750_v10 = vsel %vm749_vm12, %v1514_v3, %v1515_v2 }
 0x28b   : > { %v1518_v9 = vpop.permute.xlu0 %1517 }
 0x28c   : > { %v751_v11 = vsel %vm749_vm12, %v1549_v6, %v1550_v5  ;;  %v1520_v41 = vunpack.i.h.bf16 %v1518_v9  ;;  %v1519_v42 = vunpack.i.l.bf16 %v1518_v9 }
 0x28d   : > { %v1553_v12 = vpop.permute.xlu1 %1552  ;;  %v760_v13 = vpack.c.bf16 %v751_v11, %v750_v10 }
 0x28e   : > { %v1555_v36 = vunpack.i.h.bf16 %v1553_v12  ;;  %v1554_v37 = vunpack.i.l.bf16 %v1553_v12  ;;  %v721_v51 = vsel %vm720_vm14, %v1519_v42, %v1520_v41  ;;  %v1673_v12 = vld [vmem:[%s2158_s7] sm:$0xff]  }
 0x28f   : > { %v1523_v14 = vpop.permute.xlu0 %1522  ;;  %1387 = vmatpush3.bf16.msra.mxu1 %v760_v13 }
 0x290   : > { %v1525_v15 = vunpack.i.h.bf16 %v1523_v14  ;;  %v1524_v16 = vunpack.i.l.bf16 %v1523_v14  ;;  %1388 = vmatprep.subr.bf16.mxu1 %v1734_v58  ;;  %v722_v49 = vsel %vm720_vm14, %v1554_v37, %v1555_v36 }
 0x291   : > { %v1558_v17 = vpop.permute.xlu1 %1557  ;;  %v1318_v55 = vpack.c.bf16 %v722_v49, %v721_v51 }
 0x292   : > { %v1560_v18 = vunpack.i.h.bf16 %v1558_v17  ;;  %v1559_v19 = vunpack.i.l.bf16 %v1558_v17  ;;  %v783_v21 = vsel %vm782_vm13, %v1524_v16, %v1525_v15 }
 0x293   : > { %v2000_v20 = vpop.permute.xlu0 %1527 }
 0x294   : > { %v784_v22 = vsel %vm782_vm13, %v1559_v19, %v1560_v18  ;;  %v1530_v60 = vunpack.i.h.bf16 %v2000_v20  ;;  %v1529_v61 = vunpack.i.l.bf16 %v2000_v20 }
 0x295   : > { %v1298_v23 = vpack.c.bf16 %v784_v22, %v783_v21  ;;  %v1563_v24 = vpop.permute.xlu1 %1562 }
 0x296   : > { %v1565_v57 = vunpack.i.h.bf16 %v1563_v24  ;;  %v1564_v59 = vunpack.i.l.bf16 %v1563_v24  ;;  %v973_v13 = vsel %vm863_vm1, %v1529_v61, %v1530_v60 }
 0x297   : > { %v2004_v25 = vpop.permute.xlu0 %1532  ;;  %1367 = vmatpush3.bf16.msk.msra.mxu0 %vm1956_vm10, %v1298_v23 }
 0x298   : > { %1368 = vmatprep.subr.bf16.mxu0 %v1734_v58  ;;  %v974_v9 = vsel %vm863_vm1, %v1564_v59, %v1565_v57  ;;  %v1535_v14 = vunpack.i.h.bf16 %v2004_v25  ;;  %v1534_v15 = vunpack.i.l.bf16 %v2004_v25 }
 0x299   : > { %v2009_v26 = vpop.permute.xlu1 %1567  ;;  %v1328_v21 = vpack.c.bf16 %v974_v9, %v973_v13 }
 0x29a   : > { %v1570_v3 = vunpack.i.h.bf16 %v2009_v26  ;;  %v1569_v4 = vunpack.i.l.bf16 %v2009_v26 }
 0x29b   : > { %v2011_v27 = vpop.permute.xlu0 %1537 }
 0x29c   : > { %v842_v22 = vsel %vm840_vm2, %v1569_v4, %v1570_v3  ;;  %v1539_v36 = vunpack.i.l.bf16 %v2011_v27 }
 0x29d   : > { %v2013_v28 = vpop.permute.xlu1 %1572 }
 0x29e   : > { %v1575_v26 = vunpack.i.h.bf16 %v2013_v28  ;;  %v1574_v25 = vunpack.i.l.bf16 %v2013_v28 }
 0x29f   : > { %v2015_v29 = vpop.permute.xlu0 %1542 }
 0x2a0   : > { %v1032_v49 = vsel %vm1030_vm3, %v1574_v25, %v1575_v26  ;;  %v1674_v25 = vld [vmem:[%s2158_s7 + $0x8] sm:$0xff]  }
 0x2a1   : > { %v2017_v30 = vpop.permute.xlu1 %1577 }
 0x2a3   : > { %v1583_v32 = vpop.permute.xlu0 %1582 }
 0x2a4   : > { %v1585_v33 = vunpack.i.h.bf16 %v1583_v32  ;;  %v1584_v34 = vunpack.i.l.bf16 %v1583_v32 }
 0x2a5   : > { %v1618_v35 = vpop.permute.xlu1 %1617 }
 0x2a6   : > { %v1620_v38 = vunpack.i.h.bf16 %v1618_v35  ;;  %v1619_v39 = vunpack.i.l.bf16 %v1618_v35  ;;  %v752_v43 = vsel %vm749_vm12, %v1584_v34, %v1585_v33  ;;  %v841_v34 = vsel %vm840_vm2, %v1534_v15, %v1535_v14 }
 0x2a7   : > { %v2019_v40 = vpop.permute.xlu0 %1587  ;;  %v1540_v35 = vunpack.i.h.bf16 %v2011_v27  ;;  %v851_v42 = vpack.c.bf16 %v842_v22, %v841_v34  ;;  %v1580_v27 = vunpack.i.h.bf16 %v2017_v30 }
 0x2a8   : > { %v753_v45 = vsel %vm749_vm12, %v1619_v39, %v1620_v38  ;;  %v1589_v3 = vunpack.i.l.bf16 %v2019_v40 }
 0x2a9   : > { %v2023_v47 = vpop.permute.xlu1 %1622  ;;  %v761_v48 = vpack.c.bf16 %v753_v45, %v752_v43  ;;  %v1579_v43 = vunpack.i.l.bf16 %v2017_v30 }
 0x2aa   : > { %v1624_v44 = vunpack.i.l.bf16 %v2023_v47 }
 0x2ab   : > { %v1593_v50 = vpop.permute.xlu0 %1592  ;;  %1389 = vmatpush3.bf16.msra.mxu1 %v761_v48  ;;  %v813_v60 = vsel %vm811_vm4, %v1579_v43, %v1580_v27  ;;  %v1153_v43 = vld [vmem:[%s405_s15 + $0x10] sm:$0xff] (%p1838_p6) }
 0x2ac   : > { %v1595_v52 = vunpack.i.h.bf16 %v1593_v50  ;;  %v1594_v53 = vunpack.i.l.bf16 %v1593_v50  ;;  %1390 = vmatprep.subr.bf16.mxu1 %v1734_v58  ;;  %1154 = vst [vmem:[%s1115_s19 + $0x20] sm:$0xff] (%p1838_p6), %v1153_v43 }
 0x2ad   : > { %v1633_v56 = vpop.permute.xlu1 %1632 }
 0x2ae   : > { %v1635_v46 = vunpack.i.h.bf16 %v1633_v56  ;;  %v1634_v31 = vunpack.i.l.bf16 %v1633_v56  ;;  %v723_v63 = vsel %vm720_vm14, %v1594_v53, %v1595_v52  ;;  %v1031_v52 = vsel %vm1030_vm3, %v1539_v36, %v1540_v35  ;;  %v1675_v35 = vld [vmem:[%s2158_s7 + $0x10] sm:$0xff]  }
 0x2af   : > { %v1598_v62 = vpop.permute.xlu0 %1597  ;;  %1391 = vmatpush3.bf16.msk.msra.mxu1 %vm2030_vm0, %v1318_v55  ;;  %v1545_v53 = vunpack.i.h.bf16 %v2015_v29  ;;  %v1544_v55 = vunpack.i.l.bf16 %v2015_v29 }
 0x2b0   : > { %v724_v0 = vsel %vm720_vm14, %v1634_v31, %v1635_v46  ;;  %v1600_v1 = vunpack.i.h.bf16 %v1598_v62  ;;  %v1599_v2 = vunpack.i.l.bf16 %v1598_v62  ;;  %1392 = vmatprep.subr.bf16.mxu1 %v1734_v58  ;;  %v1041_v31 = vpack.c.bf16 %v1032_v49, %v1031_v52 }
 0x2b1   : > { %v1321_v5 = vpack.c.bf16 %v724_v0, %v723_v63  ;;  %v1638_v6 = vpop.permute.xlu1 %1637  ;;  %v1625_v62 = vunpack.i.h.bf16 %v2023_v47 }
 0x2b2   : > { %v1640_v10 = vunpack.i.h.bf16 %v1638_v6  ;;  %v1639_v11 = vunpack.i.l.bf16 %v1638_v6  ;;  %v785_v17 = vsel %vm782_vm13, %v1599_v2, %v1600_v1  ;;  %v812_v1 = vsel %vm811_vm4, %v1544_v55, %v1545_v53 }
 0x2b3   : > { %v1603_v16 = vpop.permute.xlu0 %1602  ;;  %1393 = vmatpush3.bf16.msk.msra.mxu1 %vm2030_vm0, %v1321_v5  ;;  %v1590_v2 = vunpack.i.h.bf16 %v2019_v40  ;;  %v1304_v47 = vpack.c.bf16 %v813_v60, %v812_v1  ;;  %v1003_v13 = vsel %vm1001_vm5, %v1624_v44, %v1625_v62 }
 0x2b4   : > { %v786_v18 = vsel %vm782_vm13, %v1639_v11, %v1640_v10  ;;  %v1605_v19 = vunpack.i.h.bf16 %v1603_v16  ;;  %v1604_v20 = vunpack.i.l.bf16 %v1603_v16  ;;  %1398 = vmatprep.subr.bf16.mxu1 %v1734_v58 }
 0x2b5   : > { %v1301_v23 = vpack.c.bf16 %v786_v18, %v785_v17  ;;  %v1643_v24 = vpop.permute.xlu1 %1642  ;;  %v1002_v15 = vsel %vm1001_vm5, %v1589_v3, %v1590_v2 }
 0x2b6   : > { %v1645_v32 = vunpack.i.h.bf16 %v1643_v24  ;;  %v1644_v33 = vunpack.i.l.bf16 %v1643_v24  ;;  %1395 = vmatmul.mubr.msk.bf16.vlgmr.msra.gmra.mrb[0].mxu1 %vm863_vm1, %v1673_v12  ;;  %v975_v28 = vsel %vm863_vm1, %v1604_v20, %v1605_v19 }
 0x2b7   : > { %v1608_v37 = vpop.permute.xlu0 %1607  ;;  %1369 = vmatpush3.bf16.msk.msra.mxu0 %vm1956_vm10, %v1301_v23  ;;  %1399 = vmatpush3.bf16.msk.msra.mxu1 %vm1956_vm10, %v1328_v21  ;;  %v1334_v21 = vpack.c.bf16 %v1003_v13, %v1002_v15 }
 0x2b8   : > { %v976_v38 = vsel %vm863_vm1, %v1644_v33, %v1645_v32  ;;  %v1610_v39 = vunpack.i.h.bf16 %v1608_v37  ;;  %v1609_v41 = vunpack.i.l.bf16 %v1608_v37  ;;  %1370 = vmatprep.subr.bf16.mxu0 %v1734_v58  ;;  %1400 = vmatprep.subr.bf16.mxu1 %v1734_v58 }
 0x2b9   : > { %v1331_v45 = vpack.c.bf16 %v976_v38, %v975_v28  ;;  %v1648_v48 = vpop.permute.xlu1 %1647  ;;  %1410 = vmatprep.mubr.msk.bf16.mxu1 %vm1744_vm11, %v1734_v58 }
 0x2ba   : > { %v1650_v50 = vunpack.i.h.bf16 %v1648_v48  ;;  %v1649_v51 = vunpack.i.l.bf16 %v1648_v48  ;;  %v843_v30 = vsel %vm840_vm2, %v1609_v41, %v1610_v39 }
 0x2bb   : > { %v1613_v56 = vpop.permute.xlu0 %1612  ;;  %1371 = vmatpush3.bf16.msra.mxu0 %v851_v42  ;;  %1401 = vmatpush3.bf16.msk.msra.mxu1 %vm1956_vm10, %v1331_v45  ;;  %v1155_v45 = vld [vmem:[%s405_s15 + $0x18] sm:$0xff] (%p1838_p6) }
 0x2bc   : > { %v844_v57 = vsel %vm840_vm2, %v1649_v51, %v1650_v50  ;;  %v1615_v59 = vunpack.i.h.bf16 %v1613_v56  ;;  %v1614_v46 = vunpack.i.l.bf16 %v1613_v56  ;;  %1372 = vmatprep.subr.bf16.mxu0 %v1734_v58  ;;  %1402 = vmatprep.subr.bf16.mxu1 %v1734_v58  ;;  %1156 = vst [vmem:[%s1115_s19 + $0x30] sm:$0xff] (%p1838_p6), %v1155_v45 }
 0x2bd   : > { %v852_v61 = vpack.c.bf16 %v844_v57, %v843_v30  ;;  %v1653_v29 = vpop.permute.xlu1 %1652 }
 0x2be   : > { %v1655_v63 = vunpack.i.h.bf16 %v1653_v29  ;;  %v1654_v0 = vunpack.i.l.bf16 %v1653_v29  ;;  %v1033_v5 = vsel %vm1030_vm3, %v1614_v46, %v1615_v59 }
 0x2bf   : > { %v1628_v4 = vpop.permute.xlu0 %1627  ;;  %1373 = vmatpush3.bf16.msra.mxu0 %v852_v61  ;;  %1403 = vmatpush3.bf16.msra.mxu1 %v1041_v31 }
 0x2c0   : > { %v1034_v6 = vsel %vm1030_vm3, %v1654_v0, %v1655_v63  ;;  %v1630_v9 = vunpack.i.h.bf16 %v1628_v4  ;;  %v1629_v10 = vunpack.i.l.bf16 %v1628_v4  ;;  %1374 = vmatprep.subr.bf16.mxu0 %v1734_v58  ;;  %1404 = vmatprep.subr.bf16.mxu1 %v1734_v58 }
 0x2c1   : > { %v1042_v11 = vpack.c.bf16 %v1034_v6, %v1033_v5  ;;  %v1658_v12 = vpop.permute.xlu1 %1657 }
 0x2c2   : > { %v1660_v14 = vunpack.i.h.bf16 %v1658_v12  ;;  %v1659_v40 = vunpack.i.l.bf16 %v1658_v12  ;;  %v814_v17 = vsel %vm811_vm4, %v1629_v10, %v1630_v9 }
 0x2c3   : > { %v1663_v16 = vpop.permute.xlu0 %1662  ;;  %1375 = vmatpush3.bf16.msk.msra.mxu0 %vm2030_vm0, %v1304_v47  ;;  %1405 = vmatpush3.bf16.msra.mxu1 %v1042_v11 }
 0x2c4   : > { %v815_v18 = vsel %vm811_vm4, %v1659_v40, %v1660_v14  ;;  %v1665_v19 = vunpack.i.h.bf16 %v1663_v16  ;;  %v1664_v20 = vunpack.i.l.bf16 %v1663_v16  ;;  %1376 = vmatprep.subr.bf16.mxu0 %v1734_v58  ;;  %1406 = vmatprep.subr.bf16.mxu1 %v1734_v58 }
 0x2c5   : > { %v1307_v22 = vpack.c.bf16 %v815_v18, %v814_v17  ;;  %v1668_v23 = vpop.permute.xlu1 %1667 }
 0x2c6   : > { %v1670_v24 = vunpack.i.h.bf16 %v1668_v23  ;;  %v1669_v26 = vunpack.i.l.bf16 %v1668_v23  ;;  %v1004_v32 = vsel %vm1001_vm5, %v1664_v20, %v1665_v19 }
 0x2c7   : > { %1377 = vmatpush3.bf16.msk.msra.mxu0 %vm2030_vm0, %v1307_v22  ;;  %1407 = vmatpush3.bf16.msk.msra.mxu1 %vm2030_vm0, %v1334_v21 }
 0x2c8   : > { %v1005_v33 = vsel %vm1001_vm5, %v1669_v26, %v1670_v24  ;;  %1408 = vmatprep.subr.bf16.mxu1 %v1734_v58 }
 0x2c9   : > { %v1337_v34 = vpack.c.bf16 %v1005_v33, %v1004_v32 }
 0x2ca   : > { %1379 = vmatmul.mubr.msk.bf16.vlgmr.msra.gmra.mrb[8].mxu0 %vm863_vm1, %v1674_v25 }
 0x2cb   : > { %1409 = vmatpush3.bf16.msk.msra.mxu1 %vm2030_vm0, %v1337_v34 }
 0x2ce   : > { %1411 = vmatmul.mubr.msk.bf16.vlgmr.msra.gmra.mrb[0].mxu1 %vm863_vm1, %v1675_v35 }
 0x39d   : > { %v901_v58 = vpop.f32.mrb[8].mxu0 }
 0x39e   : > { %v1380_v36 = vpop.f32.mrb[9].mxu0 }
 0x39f   : > { %v904_v37 = vpop.f32.mrb[10].mxu0 }
 0x3a0   : > { %v1381_v28 = vpop.f32.mrb[11].mxu0  ;;  %1111 = sbr.rel (!%p1838_p6) target bundleno = 943 (0x3af), region = 94 }
 0x3a1   : > { %v1090_v38 = vpop.f32.mrb[0].mxu1 }
 0x3a2   : > { %v1414_v39 = vadd.f32 %v1090_v38, %v901_v58  ;;  %v1412_v41 = vpop.f32.mrb[1].mxu1 }
 0x3a3   : > { %v1093_v42 = vpop.f32.mrb[2].mxu1 }
 0x3a4   : > { %1099 = vst [vmem:[%s405_s15] sm:$0xff] %v1414_v39  ;;  %v1415_v54 = vadd.f32 %v1093_v42, %v904_v37  ;;  %v1413_v27 = vpop.f32.mrb[3].mxu1 }
 0x3a6   : > { %1100 = vst [vmem:[%s405_s15 + $0x8] sm:$0xff] %v1415_v54 }
 0x3ab   : > { %v1149_v8 = vld [vmem:[%s405_s15] sm:$0xff] }
 0x3ac   : > { %1150 = vst [vmem:[%s1115_s19] sm:$0xff] %v1149_v8 }
 0x3ad   : > { %v1151_v7 = vld [vmem:[%s405_s15 + $0x8] sm:$0xff] }
 0x3ae   : > { %1152 = vst [vmem:[%s1115_s19 + $0x10] sm:$0xff] %v1151_v7 }
 0x3af PF: > { %s18_s11 = sadd.s32 1, %s1730_s11   ;;  %s2173_s27 = smov %s1710_s28 }
 0x3b0   : > { %p15_p2 = scmp.ge.s32.totalorder %s18_s11, 6   ;;  %s2174_s28 = smov %s1846_s20 }
 0x3b1   : > { %s2175_s29 = smov %s1722_s9  ;;  %s2176_s30 = smov %s1726_s10 }
 0x3b2   : > { %s2177_s9 = smov %s2180_s12  ;;  %s2178_s10 = smov %s2184_s13 }
 0x3b3   :  { %17 = sbr.rel (!%p15_p2) target bundleno = 6 (0x6), region = 171 }

</bundles_post_ra>
